<compile_context>
chip_gen: v7x
topology: tpu7x:2x2x1
jax: 0.10.0
libtpu: 0.0.40
codegen_flags: <defaults>
</compile_context>

<pallas_src>
import jax
import jax.numpy as jnp
from jax.experimental import pallas as pl
from jax.experimental.pallas import tpu as pltpu

VERY_NEGATIVE_NUMBER = -1e30


# --------------------------------------------------------------------------
# Fused kernel: DAGAttention2D + Classifier
#   x_cat   : (N, L, 2H)  = cat(leaves, ancestors) on the feature axis
#   mask3   : (N, L, 1)   float32 (0/1), ancestor axis already on sublanes
#   w1      : (2H, A), b1 : (1, A)       -- torch linear1.weight.T / bias
#   w2row   : (1, A)                     -- torch linear2.weight (as a row)
#   b2      : (1,)  in SMEM              -- torch linear2.bias
#   x_hid   : (B, H), wc : (H, O), bc : (1, O)  -- classifier
# outputs:
#   dag_out : (N, H)
#   cls_out : (B, O)
# --------------------------------------------------------------------------
def _fused_kernel(xcat_ref, mask_ref, w1_ref, b1_ref, w2_ref, b2_ref,
                  xhid_ref, wc_ref, bc_ref,
                  dag_out_ref, cls_out_ref):
    N, L, H2 = xcat_ref.shape
    H = H2 // 2

    m3 = mask_ref[...]                                  # (N, L, 1)
    # cat(leaves*m, ancestors*m) == cat(leaves, ancestors) * m
    xm = xcat_ref[...] * m3                             # (N, L, 2H)

    # one K=2H MXU pass (instead of two K=H passes)
    h = jnp.dot(xm.reshape(N * L, H2), w1_ref[...],
                preferred_element_type=jnp.float32)     # (N*L, A)
    h = jnp.maximum(h + b1_ref[...], 0.0)

    # attention score: VPU multiply + XLU lane-reduce instead of a
    # lane-width-1 MXU matmul.
    score = jnp.sum(h * w2_ref[...], axis=-1, keepdims=True)   # (N*L, 1)
    score = score.reshape(N, L, 1) + b2_ref[0]                  # (N, L, 1)
    score = score + (1.0 - m3) * VERY_NEGATIVE_NUMBER

    # softmax over the ancestor axis (dim=1)
    score = score - jnp.max(score, axis=1, keepdims=True)
    e = jnp.exp(score)
    attn = e / jnp.sum(e, axis=1, keepdims=True)                # (N, L, 1)

    # (attn * ancestors * mask).sum(dim=1); ancestors*mask is the second
    # half of the already-masked concatenation.
    dag_out_ref[...] = jnp.sum(attn * xm[:, :, H:], axis=1)     # (N, H)

    # Classifier: dropout is identity at inference, activation=None
    cls_out_ref[...] = (jnp.dot(xhid_ref[...], wc_ref[...],
                                preferred_element_type=jnp.float32)
                        + bc_ref[...])


def fused_model_pallas(leaves, ancestors, mask, w1, b1, w2, b2,
                       x_hidden, wc, bc):
    N, L, H = leaves.shape
    A = w1.shape[1]
    B = x_hidden.shape[0]
    O = wc.shape[1]

    x_cat = jnp.concatenate([leaves, ancestors], axis=-1)   # (N, L, 2H)
    mask3 = mask.reshape(N, L, 1)

    dag_out, cls_out = pl.pallas_call(
        _fused_kernel,
        out_shape=(jax.ShapeDtypeStruct((N, H), jnp.float32),
                   jax.ShapeDtypeStruct((B, O), jnp.float32)),
        grid=(1,),
        in_specs=[
            pl.BlockSpec((N, L, 2 * H), lambda i: (0, 0, 0)),
            pl.BlockSpec((N, L, 1), lambda i: (0, 0, 0)),
            pl.BlockSpec((2 * H, A), lambda i: (0, 0)),
            pl.BlockSpec((1, A), lambda i: (0, 0)),
            pl.BlockSpec((1, A), lambda i: (0, 0)),
            pl.BlockSpec(memory_space=pltpu.MemorySpace.SMEM),   # b2 scalar
            pl.BlockSpec((B, H), lambda i: (0, 0)),
            pl.BlockSpec((H, O), lambda i: (0, 0)),
            pl.BlockSpec((1, O), lambda i: (0, 0)),
        ],
        out_specs=(pl.BlockSpec((N, H), lambda i: (0, 0)),
                   pl.BlockSpec((B, O), lambda i: (0, 0))),
        compiler_params=pltpu.CompilerParams(
            dimension_semantics=("arbitrary",)),
    )(x_cat, mask3, w1, b1.reshape(1, A), w2.reshape(1, A),
      b2.reshape(1), x_hidden, wc, bc.reshape(1, O))
    return dag_out, cls_out


# --------------------------------------------------------------------------
# Pure-JAX references (for correctness check)
# --------------------------------------------------------------------------
def dag_attention_ref(leaves, ancestors, mask, w1, b1, w2, b2):
    m3 = mask[:, :, None]
    x = jnp.concatenate([leaves * m3, ancestors * m3], axis=-1)
    x = jnp.maximum(x @ w1 + b1, 0.0)
    x = x @ w2 + b2                                   # (N, L, 1)
    x = x + (1.0 - m3) * VERY_NEGATIVE_NUMBER
    x = jax.nn.softmax(x, axis=1)
    return jnp.sum(x * ancestors * m3, axis=1)


def classifier_ref(x, w, b):
    return x @ w + b


# --------------------------------------------------------------------------
if __name__ == "__main__":
    key = jax.random.PRNGKey(0)
    ks = jax.random.split(key, 10)

    # small, model-consistent shapes
    num_tree_nodes = 16     # config.num_tree_nodes
    H = 32                  # config.hidden_size  (DAGAttention2D(2H, H))
    L = 8                   # ancestors per node
    N = 8                   # number of DAG nodes (len(leaves_list))
    B = 2                   # batch for the classifier
    OUT = 8                 # output_size

    # deterministic "parameters"
    embed_init = jax.random.normal(ks[0], (num_tree_nodes, H), jnp.float32) * 0.1
    w1 = jax.random.normal(ks[1], (2 * H, H), jnp.float32) * 0.1   # linear1
    b1 = jax.random.normal(ks[2], (H,), jnp.float32) * 0.1
    w2 = jax.random.normal(ks[3], (H, 1), jnp.float32) * 0.1       # linear2
    b2 = jax.random.normal(ks[4], (1,), jnp.float32) * 0.1
    wc = jax.random.normal(ks[5], (H, OUT), jnp.float32) * 0.1     # classifier
    bc = jax.random.normal(ks[6], (OUT,), jnp.float32) * 0.1

    # deterministic "inputs" (config.leaves_list / ancestors_list / masks_list)
    leaves_ids = jax.random.randint(ks[7], (N, L), 0, num_tree_nodes)
    ancestors_ids = jax.random.randint(ks[8], (N, L), 0, num_tree_nodes)
    masks_list = (jax.random.uniform(ks[9], (N, L)) > 0.3).astype(jnp.float32)

    # ---- forward (the translatable portion of Model.forward) ----
    # embedding lookups are glue in plain JAX
    leaves_emb = embed_init[leaves_ids]          # (N, L, H)
    ancestors_emb = embed_init[ancestors_ids]    # (N, L, H)

    # Pooled patient representation for the classifier.  In the real model it
    # comes from DotProductAttention over visit states; that module is
    # undefined, so use a deterministic stand-in of the right shape (B, H).
    x_hidden = jax.random.normal(jax.random.PRNGKey(1), (B, H), jnp.float32)

    # single fused Pallas kernel: DAGAttention2D + Classifier
    dag_emb, logits = fused_model_pallas(leaves_emb, ancestors_emb, masks_list,
                                         w1, b1, w2, b2, x_hidden, wc, bc)

    # dict_matrix = cat([zeros(1, H), dag_emb])  -> embed_dag table (glue)
    dict_matrix = jnp.concatenate([jnp.zeros((1, H), jnp.float32), dag_emb], 0)
    _ = dict_matrix  # feeds self.embed_dag; downstream Bert path is undefined

    jax.block_until_ready((dag_emb, logits))

    # correctness checks against pure-JAX references
    dag_ref = dag_attention_ref(leaves_emb, ancestors_emb, masks_list,
                                w1, b1, w2, b2)
    cls_ref = classifier_ref(x_hidden, wc, bc)
    assert jnp.allclose(dag_emb, dag_ref, atol=1e-4, rtol=1e-4)
    assert jnp.allclose(logits, cls_ref, atol=1e-4, rtol=1e-4)

    print("KERNEL_OK")
</pallas_src>

<mosaic_0001>
module attributes {stable_mosaic.version = 11 : i64} {
  func.func @_fused_kernel(%arg0: i32, %arg1: memref<8x8x64xf32, #tpu.memory_space<vmem>>, %arg2: memref<8x8x1xf32, #tpu.memory_space<vmem>>, %arg3: memref<64x32xf32, #tpu.memory_space<vmem>>, %arg4: memref<1x32xf32, #tpu.memory_space<vmem>>, %arg5: memref<1x32xf32, #tpu.memory_space<vmem>>, %arg6: memref<1xf32, #tpu.memory_space<smem>>, %arg7: memref<2x32xf32, #tpu.memory_space<vmem>>, %arg8: memref<32x8xf32, #tpu.memory_space<vmem>>, %arg9: memref<1x8xf32, #tpu.memory_space<vmem>>, %arg10: memref<8x32xf32, #tpu.memory_space<vmem>>, %arg11: memref<2x8xf32, #tpu.memory_space<vmem>>) attributes {dimension_semantics = [#tpu.dimension_semantics<arbitrary>], iteration_bounds = array<i64: 1>, scalar_prefetch = 0 : i64, scratch_operands = 0 : i64, tpu.core_type = #tpu.core_type<tc>, window_params = [{pipeline_mode = #tpu.pipeline_mode<synchronous>, transform_indices = @transform_0, window_bounds = array<i64: 8, 8, 64>}, {pipeline_mode = #tpu.pipeline_mode<synchronous>, transform_indices = @transform_1, window_bounds = array<i64: 8, 8, 1>}, {pipeline_mode = #tpu.pipeline_mode<synchronous>, transform_indices = @transform_2, window_bounds = array<i64: 64, 32>}, {pipeline_mode = #tpu.pipeline_mode<synchronous>, transform_indices = @transform_3, window_bounds = array<i64: 1, 32>}, {pipeline_mode = #tpu.pipeline_mode<synchronous>, transform_indices = @transform_4, window_bounds = array<i64: 1, 32>}, {transform_indices = @transform_5, window_bounds = array<i64: 1>}, {pipeline_mode = #tpu.pipeline_mode<synchronous>, transform_indices = @transform_6, window_bounds = array<i64: 2, 32>}, {pipeline_mode = #tpu.pipeline_mode<synchronous>, transform_indices = @transform_7, window_bounds = array<i64: 32, 8>}, {pipeline_mode = #tpu.pipeline_mode<synchronous>, transform_indices = @transform_8, window_bounds = array<i64: 1, 8>}, {pipeline_mode = #tpu.pipeline_mode<synchronous>, transform_indices = @transform_9, window_bounds = array<i64: 8, 32>}, {pipeline_mode = #tpu.pipeline_mode<synchronous>, transform_indices = @transform_10, window_bounds = array<i64: 2, 8>}]} {
    %c0 = arith.constant 0 : index
    %c0_0 = arith.constant 0 : index
    %c0_1 = arith.constant 0 : index
    %0 = vector.load %arg2[%c0, %c0_0, %c0_1] : memref<8x8x1xf32, #tpu.memory_space<vmem>>, vector<8x8x1xf32>
    %c0_2 = arith.constant 0 : index
    %c0_3 = arith.constant 0 : index
    %c0_4 = arith.constant 0 : index
    %1 = vector.load %arg1[%c0_2, %c0_3, %c0_4] : memref<8x8x64xf32, #tpu.memory_space<vmem>>, vector<8x8x64xf32>
    %2 = vector.broadcast %0 : vector<8x8x1xf32> to vector<8x8x64xf32>
    %3 = arith.mulf %1, %2 : vector<8x8x64xf32>
    %4 = vector.shape_cast %3 : vector<8x8x64xf32> to vector<64x64xf32>
    %c0_5 = arith.constant 0 : index
    %c0_6 = arith.constant 0 : index
    %5 = vector.load %arg3[%c0_5, %c0_6] : memref<64x32xf32, #tpu.memory_space<vmem>>, vector<64x32xf32>
    %cst = arith.constant dense<0.000000e+00> : vector<64x32xf32>
    %6 = tpu.matmul %4, %5, %cst {dimension_numbers = #tpu.dot_dimension_numbers<[1], [0], [0], [1], [0, 0, 1, 1], [], []>} : vector<64x64xf32>, vector<64x32xf32>, vector<64x32xf32> -> vector<64x32xf32>
    %c0_7 = arith.constant 0 : index
    %c0_8 = arith.constant 0 : index
    %7 = vector.load %arg4[%c0_7, %c0_8] : memref<1x32xf32, #tpu.memory_space<vmem>>, vector<1x32xf32>
    %8 = vector.broadcast %7 : vector<1x32xf32> to vector<64x32xf32>
    %9 = arith.addf %6, %8 : vector<64x32xf32>
    %cst_9 = arith.constant 0.000000e+00 : f32
    %10 = vector.broadcast %cst_9 : f32 to vector<64x32xf32>
    %11 = arith.maximumf %9, %10 : vector<64x32xf32>
    %c0_10 = arith.constant 0 : index
    %c0_11 = arith.constant 0 : index
    %12 = vector.load %arg5[%c0_10, %c0_11] : memref<1x32xf32, #tpu.memory_space<vmem>>, vector<1x32xf32>
    %13 = vector.broadcast %12 : vector<1x32xf32> to vector<64x32xf32>
    %14 = arith.mulf %11, %13 : vector<64x32xf32>
    %cst_12 = arith.constant dense<0.000000e+00> : vector<64xf32>
    %15 = vector.multi_reduction <add>, %14, %cst_12 [1] : vector<64x32xf32> to vector<64xf32>
    %16 = vector.shape_cast %15 : vector<64xf32> to vector<64x1xf32>
    %17 = vector.shape_cast %16 : vector<64x1xf32> to vector<8x8x1xf32>
    %c0_13 = arith.constant 0 : index
    %18 = memref.load %arg6[%c0_13] : memref<1xf32, #tpu.memory_space<smem>>
    %19 = vector.broadcast %18 : f32 to vector<8x8x1xf32>
    %20 = arith.addf %17, %19 : vector<8x8x1xf32>
    %cst_14 = arith.constant 1.000000e+00 : f32
    %21 = vector.broadcast %cst_14 : f32 to vector<8x8x1xf32>
    %22 = arith.subf %21, %0 : vector<8x8x1xf32>
    %cst_15 = arith.constant -1.000000e+30 : f32
    %23 = vector.broadcast %cst_15 : f32 to vector<8x8x1xf32>
    %24 = arith.mulf %22, %23 : vector<8x8x1xf32>
    %25 = arith.addf %20, %24 : vector<8x8x1xf32>
    %cst_16 = arith.constant dense<0xFF800000> : vector<8x1xf32>
    %26 = vector.multi_reduction <maximumf>, %25, %cst_16 [1] : vector<8x8x1xf32> to vector<8x1xf32>
    %27 = vector.shape_cast %26 : vector<8x1xf32> to vector<8x1x1xf32>
    %28 = vector.broadcast %27 : vector<8x1x1xf32> to vector<8x8x1xf32>
    %29 = arith.subf %25, %28 : vector<8x8x1xf32>
    %30 = math.exp %29 : vector<8x8x1xf32>
    %cst_17 = arith.constant dense<0.000000e+00> : vector<8x1xf32>
    %31 = vector.multi_reduction <add>, %30, %cst_17 [1] : vector<8x8x1xf32> to vector<8x1xf32>
    %32 = vector.shape_cast %31 : vector<8x1xf32> to vector<8x1x1xf32>
    %33 = vector.broadcast %32 : vector<8x1x1xf32> to vector<8x8x1xf32>
    %34 = arith.divf %30, %33 : vector<8x8x1xf32>
    %35 = vector.extract_strided_slice %3 {offsets = [0, 0, 32], sizes = [8, 8, 32], strides = [1, 1, 1]} : vector<8x8x64xf32> to vector<8x8x32xf32>
    %36 = vector.broadcast %34 : vector<8x8x1xf32> to vector<8x8x32xf32>
    %37 = arith.mulf %36, %35 : vector<8x8x32xf32>
    %cst_18 = arith.constant dense<0.000000e+00> : vector<8x32xf32>
    %38 = vector.multi_reduction <add>, %37, %cst_18 [1] : vector<8x8x32xf32> to vector<8x32xf32>
    %c0_19 = arith.constant 0 : index
    %c0_20 = arith.constant 0 : index
    %39 = vector.load %arg10[%c0_19, %c0_20] : memref<8x32xf32, #tpu.memory_space<vmem>>, vector<8x32xf32>
    tpu.vector_store %arg10[%c0_19, %c0_20], %38 {strides = array<i32>} : memref<8x32xf32, #tpu.memory_space<vmem>>, vector<8x32xf32>,
    %c0_21 = arith.constant 0 : index
    %c0_22 = arith.constant 0 : index
    %40 = vector.load %arg7[%c0_21, %c0_22] : memref<2x32xf32, #tpu.memory_space<vmem>>, vector<2x32xf32>
    %c0_23 = arith.constant 0 : index
    %c0_24 = arith.constant 0 : index
    %41 = vector.load %arg8[%c0_23, %c0_24] : memref<32x8xf32, #tpu.memory_space<vmem>>, vector<32x8xf32>
    %cst_25 = arith.constant dense<0.000000e+00> : vector<2x8xf32>
    %42 = tpu.matmul %40, %41, %cst_25 {dimension_numbers = #tpu.dot_dimension_numbers<[1], [0], [0], [1], [0, 0, 1, 1], [], []>} : vector<2x32xf32>, vector<32x8xf32>, vector<2x8xf32> -> vector<2x8xf32>
    %c0_26 = arith.constant 0 : index
    %c0_27 = arith.constant 0 : index
    %43 = vector.load %arg9[%c0_26, %c0_27] : memref<1x8xf32, #tpu.memory_space<vmem>>, vector<1x8xf32>
    %44 = vector.broadcast %43 : vector<1x8xf32> to vector<2x8xf32>
    %45 = arith.addf %42, %44 : vector<2x8xf32>
    %c0_28 = arith.constant 0 : index
    %c0_29 = arith.constant 0 : index
    %46 = vector.load %arg11[%c0_28, %c0_29] : memref<2x8xf32, #tpu.memory_space<vmem>>, vector<2x8xf32>
    tpu.vector_store %arg11[%c0_28, %c0_29], %45 {strides = array<i32>} : memref<2x8xf32, #tpu.memory_space<vmem>>, vector<2x8xf32>,
    return
  }
  func.func @transform_0(%arg0: i32) -> (i32, i32, i32) {
    %c0_i32 = arith.constant 0 : i32
    %c0_i32_0 = arith.constant 0 : i32
    %c0_i32_1 = arith.constant 0 : i32
    %c0_i32_2 = arith.constant 0 : i32
    return %c0_i32, %c0_i32_0, %c0_i32_1 : i32, i32, i32
  }
  func.func @transform_1(%arg0: i32) -> (i32, i32, i32) {
    %c0_i32 = arith.constant 0 : i32
    %c0_i32_0 = arith.constant 0 : i32
    %c0_i32_1 = arith.constant 0 : i32
    %c0_i32_2 = arith.constant 0 : i32
    return %c0_i32, %c0_i32_0, %c0_i32_1 : i32, i32, i32
  }
  func.func @transform_2(%arg0: i32) -> (i32, i32) {
    %c0_i32 = arith.constant 0 : i32
    %c0_i32_0 = arith.constant 0 : i32
    %c0_i32_1 = arith.constant 0 : i32
    return %c0_i32, %c0_i32_0 : i32, i32
  }
  func.func @transform_3(%arg0: i32) -> (i32, i32) {
    %c0_i32 = arith.constant 0 : i32
    %c0_i32_0 = arith.constant 0 : i32
    %c0_i32_1 = arith.constant 0 : i32
    return %c0_i32, %c0_i32_0 : i32, i32
  }
  func.func @transform_4(%arg0: i32) -> (i32, i32) {
    %c0_i32 = arith.constant 0 : i32
    %c0_i32_0 = arith.constant 0 : i32
    %c0_i32_1 = arith.constant 0 : i32
    return %c0_i32, %c0_i32_0 : i32, i32
  }
  func.func @transform_5(%arg0: i32) -> i32 {
    %c0_i32 = arith.constant 0 : i32
    %c0_i32_0 = arith.constant 0 : i32
    return %c0_i32 : i32
  }
  func.func @transform_6(%arg0: i32) -> (i32, i32) {
    %c0_i32 = arith.constant 0 : i32
    %c0_i32_0 = arith.constant 0 : i32
    %c0_i32_1 = arith.constant 0 : i32
    return %c0_i32, %c0_i32_0 : i32, i32
  }
  func.func @transform_7(%arg0: i32) -> (i32, i32) {
    %c0_i32 = arith.constant 0 : i32
    %c0_i32_0 = arith.constant 0 : i32
    %c0_i32_1 = arith.constant 0 : i32
    return %c0_i32, %c0_i32_0 : i32, i32
  }
  func.func @transform_8(%arg0: i32) -> (i32, i32) {
    %c0_i32 = arith.constant 0 : i32
    %c0_i32_0 = arith.constant 0 : i32
    %c0_i32_1 = arith.constant 0 : i32
    return %c0_i32, %c0_i32_0 : i32, i32
  }
  func.func @transform_9(%arg0: i32) -> (i32, i32) {
    %c0_i32 = arith.constant 0 : i32
    %c0_i32_0 = arith.constant 0 : i32
    %c0_i32_1 = arith.constant 0 : i32
    return %c0_i32, %c0_i32_0 : i32, i32
  }
  func.func @transform_10(%arg0: i32) -> (i32, i32) {
    %c0_i32 = arith.constant 0 : i32
    %c0_i32_0 = arith.constant 0 : i32
    %c0_i32_1 = arith.constant 0 : i32
    return %c0_i32, %c0_i32_0 : i32, i32
  }
}

</mosaic_0001>

<bundles_post_ra>
// kernel: tpu_custom_call.1
= control target key start
LH: loop header
LB: loop body
LE: loop exit
PB: predicated region body
PF: predicated region fallthrough
CT: control target
= control target key end

     0   :  { %17 = vsyncpa [#allocation4], 0  ;;  %v910_v2 = vmov 0   ;;  %s1245_s0 = inlined_call_operand.vmem [shape: f32[8,8,64], index: 0, kind: input, shape index: {}]   ;;  %s1246_s1 = inlined_call_operand.vmem [shape: f32[8,8,1], index: 1, kind: input, shape index: {}]   ;;  %s1247_s2 = inlined_call_operand.vmem [shape: f32[64,32], index: 2, kind: input, shape index: {}]   ;;  %s1248_s3 = inlined_call_operand.vmem [shape: f32[1,32], index: 3, kind: input, shape index: {}]   ;;  %s1249_s4 = inlined_call_operand.vmem [shape: f32[1,32], index: 4, kind: input, shape index: {}]   ;;  %s1250_s5 = inlined_call_operand.<no memory space> [shape: f32[1], index: 5, kind: input, shape index: {}]   ;;  %s1251_s6 = inlined_call_operand.vmem [shape: f32[2,32], index: 6, kind: input, shape index: {}]   ;;  %s1252_s7 = inlined_call_operand.vmem [shape: f32[32,8], index: 7, kind: input, shape index: {}]   ;;  %s1253_s8 = inlined_call_operand.vmem [shape: f32[1,8], index: 8, kind: input, shape index: {}]   ;;  %s1254_s9 = inlined_call_operand.hbm [shape: f32[8,32], index: 9, kind: output, shape index: {0}]   ;;  %s1255_s10 = inlined_call_operand.hbm [shape: f32[2,8], index: 10, kind: output, shape index: {1}]  }
   0x1   :  { %v975_v0 = vld [vmem:[%s1246_s1 + $0x10] sm:$0xff]  ;;  %v980_v1 = vld [vmem:[%s1246_s1] sm:$0xff]  ;;  %829 = vset.pattern.permute.xlu1 %v910_v2  ;;  %828 = vset.pattern.permute.xlu0 %v910_v2  ;;  %v987_v3 = vld [vmem:[%s1246_s1 + $0x18] sm:$0xff] }
   0x2   :  { %65 = vperm.xlu1 %829, %v975_v0   ;;  %55 = vperm.xlu0 %828, %v980_v1   ;;  %v992_v4 = vld [vmem:[%s1246_s1 + $0x8] sm:$0xff]  ;;  %v101_v5 = vld [vmem:[%s1247_s2] sm:$0xff]  ;;  %v103_v7 = vld [vmem:[%s1247_s2 + $0x10] sm:$0xff] }
   0x3   :  { %v102_v6 = vld [vmem:[%s1247_s2 + $0x8] sm:$0xff]  ;;  %v104_v8 = vld [vmem:[%s1247_s2 + $0x18] sm:$0xff]  ;;  %v1016_v11 = vld [vmem:[%s1246_s1 + $0x20] sm:$0xff] }
   0x4   :  { %v799_v9 = vpack.c.bf16 %v102_v6, %v101_v5  ;;  %v1011_v10 = vld [vmem:[%s1246_s1 + $0x28] sm:$0xff]  ;;  %v803_v12 = vpack.c.bf16 %v104_v8, %v103_v7  ;;  %v105_v13 = vld [vmem:[%s1247_s2 + $0x20] sm:$0xff] }
   0x5   :  { %v106_v14 = vld [vmem:[%s1247_s2 + $0x28] sm:$0xff] }
   0x6   :  { %70 = vperm.xlu1 %829, %v987_v3   ;;  %60 = vperm.xlu0 %828, %v992_v4  }
   0x7   :  { %800 = vmatprep.subr.bf16.mxu0 %v799_v9 }
   0x8   :  { %802 = vmatpush3.bf16.msra.mxu0 %v799_v9 }
   0x9   :  { %18 = vsyncpa [#allocation6], 0  ;;  %v1029_v15 = vld [vmem:[%s1246_s1 + $0x38] sm:$0xff]  ;;  %v1034_v16 = vld [vmem:[%s1246_s1 + $0x30] sm:$0xff]  ;;  %804 = vmatprep.subr.bf16.mxu0 %v803_v12  ;;  %v807_v17 = vpack.c.bf16 %v106_v14, %v105_v13  ;;  %vm116_vm0 = vcmask 523264   ;;  %vm269_vm1 = vcmask 261120  }
   0xa   :  { %80 = vperm.xlu1 %829, %v1011_v10   ;;  %75 = vperm.xlu0 %828, %v1016_v11   ;;  %v107_v18 = vld [vmem:[%s1247_s2 + $0x30] sm:$0xff]  ;;  %v108_v19 = vld [vmem:[%s1247_s2 + $0x38] sm:$0xff]  ;;  %v45_v21 = vld [vmem:[%s1245_s0] sm:$0xff]  ;;  %vm912_vm2 = vmmov 0   ;;  %vm328_vm3 = vcmask 7168   ;;  %vm529_vm4 = vcmask 523520  }
   0xb   :  { %v811_v20 = vpack.c.bf16 %v108_v19, %v107_v18  ;;  %v47_v24 = vld [vmem:[%s1245_s0 + $0x10] sm:$0xff]  ;;  %v46_v26 = vld [vmem:[%s1245_s0 + $0x8] sm:$0xff]  ;;  %v48_v31 = vld [vmem:[%s1245_s0 + $0x18] sm:$0xff]  ;;  %vm594_vm5 = vcmask 1041409   ;;  %vm596_vm6 = vcmask 1042434   ;;  %vm598_vm7 = vcmask 1043459  }
   0xc   :  { %806 = vmatpush3.bf16.msra.mxu0 %v803_v12  ;;  %v49_v32 = vld [vmem:[%s1245_s0 + $0x20] sm:$0xff]  ;;  %v50_v37 = vld [vmem:[%s1245_s0 + $0x28] sm:$0xff]  ;;  %v51_v38 = vld [vmem:[%s1245_s0 + $0x30] sm:$0xff]  ;;  %vm697_vm8 = vcmask 58368  }
   0xd   :  { %808 = vmatprep.subr.bf16.mxu0 %v807_v17  ;;  %v52_v42 = vld [vmem:[%s1245_s0 + $0x38] sm:$0xff]  ;;  %v727_v45 = vld [vmem:[%s1248_s3] ss:$0 sm:$0xff] }
   0xe   :  { %90 = vperm.xlu1 %829, %v1029_v15   ;;  %85 = vperm.xlu0 %828, %v1034_v16   ;;  %v736_v50 = vld [vmem:[%s1249_s4] ss:$0 sm:$0xff] }
  0x10   :  { %810 = vmatpush3.bf16.msra.mxu0 %v807_v17 }
  0x11   :  { %812 = vmatprep.subr.bf16.mxu0 %v811_v20 }
  0x14   :  { %814 = vmatpush3.bf16.msra.mxu0 %v811_v20 }
  0x81   :  { %v66_v22 = vpop.permute.xlu1 %65  ;;  %v56_v23 = vpop.permute.xlu0 %55 }
  0x82   :  { %v1050_v25 = vmul.f32 %v56_v23, %v45_v21  ;;  %v1057_v27 = vmul.f32 %v66_v22, %v47_v24 }
  0x84   :  { %776 = vmatprep.mubr.msk.f32.mxu0 %vm116_vm0, %v1050_v25 }
  0x85   :  { %v71_v28 = vpop.permute.xlu1 %70  ;;  %v61_v29 = vpop.permute.xlu0 %60 }
  0x86   :  { %v1059_v30 = vmul.f32 %v61_v29, %v46_v26  ;;  %v1071_v35 = vmul.f32 %v71_v28, %v48_v31 }
  0x88   :  { %777 = vmatmul.mubr.msk.f32.vlgmr.msra.gmra.mrb[0].mxu0 %vm116_vm0, %v1059_v30 }
  0x89   :  { %v81_v33 = vpop.permute.xlu1 %80  ;;  %779 = vmatprep.mubr.msk.f32.mxu0 %vm116_vm0, %v1057_v27  ;;  %v76_v34 = vpop.permute.xlu0 %75 }
  0x8a   :  { %v1073_v36 = vmul.f32 %v76_v34, %v49_v32  ;;  %v1085_v40 = vmul.f32 %v81_v33, %v50_v37  ;;  %v613_v34 = vld [vmem:[%s1252_s7] sm:$0xff]  ;;  %v614_v37 = vld [vmem:[%s1252_s7 + $0x8] sm:$0xff] }
  0x8c   :  { %780 = vmatmul.mubr.msk.f32.gmra.mrb[2].mxu0 %vm116_vm0, %v1071_v35 }
  0x8d   :  { %782 = vmatprep.mubr.msk.f32.mxu0 %vm116_vm0, %v1073_v36  ;;  %v86_v39 = vpop.permute.xlu0 %85  ;;  %v91_v43 = vpop.permute.xlu1 %90 }
  0x8e   :  { %v1087_v41 = vmul.f32 %v86_v39, %v51_v38  ;;  %v1096_v44 = vmul.f32 %v91_v43, %v52_v42  ;;  %v615_v38 = vld [vmem:[%s1252_s7 + $0x10] sm:$0xff]  ;;  %v911_v39 = vmov 0.0|0.0   ;;  %v816_v42 = vpack.c.bf16 %v614_v37, %v613_v34  ;;  %v616_v43 = vld [vmem:[%s1252_s7 + $0x18] sm:$0xff]  ;;  %s914_s7 = smov [#allocation5]  }
  0x8f   :  { %815 = vmatprep.subr.bf16.mxu1 %v911_v39 }
  0x90   :  { %783 = vmatmul.mubr.msk.f32.gmra.mrb[4].mxu0 %vm116_vm0, %v1085_v40  ;;  %817 = vmatpush3.bf16.msra.mxu1 %v816_v42 }
  0x91   :  { %785 = vmatprep.mubr.msk.f32.mxu0 %vm116_vm0, %v1087_v41  ;;  %818 = vmatprep.subr.bf16.mxu1 %v911_v39 }
  0x94   :  { %786 = vmatmul.mubr.msk.f32.gmra.mrb[6].mxu0 %vm116_vm0, %v1096_v44 }
 0x15b   :  { %v778_v46 = vpop.f32.mrb[0].mxu0 }
 0x15c   :  { %v213_v47 = vadd.f32 %v778_v46, %v727_v45  ;;  %v207_v48 = vpop.f32.mrb[1].mxu0  ;;  %v819_v46 = vpack.c.bf16 %v616_v43, %v615_v38 }
 0x15d   :  { %v208_v49 = vadd.f32 %v727_v45, %v207_v48  ;;  %v305_v48 = vsub.f32 1.0, %v992_v4  ;;  %v306_v4 = vsub.f32 1.0, %v975_v0 }
 0x15e   :  { %v247_v51 = vmax.f32 %v213_v47, 0.0  ;;  %820 = vmatpush3.bf16.msra.mxu1 %v819_v46  ;;  %v612_v47 = vld [vmem:[%s1251_s6] sm:$0x3] }
 0x15f   :  { %v246_v52 = vmax.f32 %v208_v49, 0.0  ;;  %v781_v53 = vpop.f32.mrb[2].mxu0  ;;  %v304_v49 = vsub.f32 1.0, %v980_v1 }
 0x160   :  { %v223_v54 = vadd.f32 %v781_v53, %v727_v45  ;;  %v217_v55 = vpop.f32.mrb[3].mxu0  ;;  %v262_v56 = vmul.f32 %v736_v50, %v247_v51  ;;  %v313_v51 = vmul.f32 -1e+30, %v305_v48  ;;  %v307_v53 = vsub.f32 1.0, %v987_v3 }
 0x161   :  { %v218_v57 = vadd.f32 %v727_v45, %v217_v55  ;;  %v261_v58 = vmul.f32 %v736_v50, %v246_v52  ;;  %v312_v52 = vmul.f32 -1e+30, %v304_v49 }
 0x162   :  { %v249_v59 = vmax.f32 %v223_v54, 0.0  ;;  %v273_v60 = vsel %vm269_vm1, %v262_v56, 0.0  ;;  %v315_v1 = vmul.f32 -1e+30, %v307_v53 }
 0x163   :  { %v248_v61 = vmax.f32 %v218_v57, 0.0  ;;  %274 = vadd.xlane.f32.xlu1 %v273_v60  ;;  %v784_v62 = vpop.f32.mrb[4].mxu0  ;;  %v270_v63 = vsel %vm269_vm1, %v261_v58, 0.0 }
 0x164   :  { %v233_v2 = vadd.f32 %v784_v62, %v727_v45  ;;  %271 = vadd.xlane.f32.xlu0 %v270_v63  ;;  %v227_v5 = vpop.f32.mrb[5].mxu0  ;;  %v264_v6 = vmul.f32 %v736_v50, %v249_v59  ;;  %v308_v59 = vsub.f32 1.0, %v1016_v11 }
 0x165   :  { %v228_v7 = vadd.f32 %v727_v45, %v227_v5  ;;  %v263_v9 = vmul.f32 %v736_v50, %v248_v61  ;;  %v314_v5 = vmul.f32 -1e+30, %v306_v4 }
 0x166   :  { %v279_v8 = vsel %vm269_vm1, %v264_v6, 0.0  ;;  %v251_v12 = vmax.f32 %v233_v2, 0.0 }
 0x167   :  { %v250_v13 = vmax.f32 %v228_v7, 0.0  ;;  %v787_v14 = vpop.f32.mrb[6].mxu0  ;;  %v276_v21 = vsel %vm269_vm1, %v263_v9, 0.0  ;;  %v316_v7 = vmul.f32 -1e+30, %v308_v59 }
 0x168   :  { %v243_v17 = vadd.f32 %v787_v14, %v727_v45  ;;  %280 = vadd.xlane.f32.xlu0 %v279_v8  ;;  %v237_v18 = vpop.f32.mrb[7].mxu0  ;;  %v266_v26 = vmul.f32 %v736_v50, %v251_v12  ;;  %v310_v8 = vsub.f32 1.0, %v1034_v16  ;;  %v309_v12 = vsub.f32 1.0, %v1011_v10 }
 0x169   :  { %v238_v19 = vadd.f32 %v727_v45, %v237_v18  ;;  %v265_v20 = vmul.f32 %v736_v50, %v250_v13  ;;  %v913_v45 = vmov 0.0  }
 0x16a   :  { %v253_v22 = vmax.f32 %v243_v17, 0.0  ;;  %v285_v29 = vsel %vm269_vm1, %v266_v26, 0.0  ;;  %796 = vmatprep.mubr.msk.f32.mxu1 %vm912_vm2, %v913_v45 }
 0x16b   :  { %v252_v23 = vmax.f32 %v238_v19, 0.0  ;;  %v282_v24 = vsel %vm269_vm1, %v265_v20, 0.0  ;;  %797 = vmatmul.mubr.msk.f32.vlgmr.msra.gmra.mrb[0].mxu1 %vm269_vm1, %v612_v47 }
 0x16c   :  { %277 = vadd.xlane.f32.xlu0 %v276_v21  ;;  %283 = vadd.xlane.f32.xlu1 %v282_v24  ;;  %v268_v32 = vmul.f32 %v736_v50, %v253_v22  ;;  %v311_v21 = vsub.f32 1.0, %v1029_v15 }
 0x16d   :  { %v267_v28 = vmul.f32 %v736_v50, %v252_v23  ;;  %v1135_v50 = vstv %s1250_s5  ;;  %v318_v23 = vmul.f32 -1e+30, %v310_v8 }
 0x16e   :  { %v291_v33 = vsel %vm269_vm1, %v268_v32, 0.0  ;;  %v319_v46 = vmul.f32 -1e+30, %v311_v21 }
 0x16f   :  { %v288_v31 = vsel %vm269_vm1, %v267_v28, 0.0  ;;  %v317_v28 = vmul.f32 -1e+30, %v309_v12 }
 0x170   :  { %286 = vadd.xlane.f32.xlu0 %v285_v29  ;;  %289 = vadd.xlane.f32.xlu1 %v288_v31 }
 0x174   :  { %292 = vadd.xlane.f32.xlu0 %v291_v33 }
 0x1f0   :  { %v275_v54 = vpop.xlane.xlu1 %274 }
 0x1f1   :  { %v297_v55 = vadd.f32 %v1135_v50, %v275_v54  ;;  %v272_v56 = vpop.xlane.xlu0 %271 }
 0x1f2   :  { %v296_v57 = vadd.f32 %v1135_v50, %v272_v56 }
 0x1f3   :  { %v321_v58 = vadd.f32 %v313_v51, %v297_v55 }
 0x1f4   :  { %v320_v60 = vadd.f32 %v312_v52, %v296_v57 }
 0x1f5   :  { %v336_v61 = vsel %vm328_vm3, %v321_v58, -inf  ;;  %v281_v62 = vpop.xlane.xlu0 %280 }
 0x1f6   :  { %v337_v63 = vrot.slane %v336_v61, 4  ;;  %v329_v3 = vsel %vm328_vm3, %v320_v60, -inf  ;;  %v299_v2 = vadd.f32 %v1135_v50, %v281_v62 }
 0x1f7   :  { %v330_v6 = vrot.slane %v329_v3, 4 }
 0x1f8   :  { %v338_v9 = vmax.f32 %v336_v61, %v337_v63  ;;  %v1146_v0 = vadd.f32 %v315_v1, %v299_v2 }
 0x1f9   :  { %v331_v11 = vmax.f32 %v329_v3, %v330_v6  ;;  %v284_v13 = vpop.xlane.xlu1 %283  ;;  %v278_v14 = vpop.xlane.xlu0 %277 }
 0x1fa   :  { %v339_v17 = vrot.slane %v338_v9, 2  ;;  %v350_v18 = vsel %vm328_vm3, %v1146_v0, -inf  ;;  %v300_v19 = vadd.f32 %v1135_v50, %v284_v13  ;;  %v298_v20 = vadd.f32 %v1135_v50, %v278_v14 }
 0x1fb   :  { %v332_v22 = vrot.slane %v331_v11, 2  ;;  %v351_v16 = vrot.slane %v350_v18, 4 }
 0x1fc   :  { %v340_v24 = vmax.f32 %v338_v9, %v339_v17  ;;  %v1154_v26 = vadd.f32 %v316_v7, %v300_v19  ;;  %v1156_v10 = vadd.f32 %v314_v5, %v298_v20 }
 0x1fd   :  { %v333_v29 = vmax.f32 %v331_v11, %v332_v22  ;;  %v352_v31 = vmax.f32 %v350_v18, %v351_v16  ;;  %v290_v32 = vpop.xlane.xlu1 %289  ;;  %v287_v33 = vpop.xlane.xlu0 %286 }
 0x1fe   :  { %v341_v34 = vrot.slane %v340_v24, 1  ;;  %v357_v37 = vsel %vm328_vm3, %v1154_v26, -inf  ;;  %v343_v15 = vsel %vm328_vm3, %v1156_v10, -inf  ;;  %v302_v38 = vadd.f32 %v1135_v50, %v290_v32 }
 0x1ff   :  { %v334_v39 = vrot.slane %v333_v29, 1  ;;  %v353_v42 = vrot.slane %v352_v31, 2  ;;  %v358_v43 = vrot.slane %v357_v37, 4  ;;  %v344_v45 = vrot.slane %v343_v15, 4 }
 0x200   :  { %v342_v47 = vmax.f32 %v340_v24, %v341_v34  ;;  %v326_v48 = vadd.f32 %v318_v23, %v302_v38  ;;  %v301_v49 = vadd.f32 %v1135_v50, %v287_v33 }
 0x201   :  { %v335_v51 = vmax.f32 %v333_v29, %v334_v39  ;;  %v354_v52 = vmax.f32 %v352_v31, %v353_v42  ;;  %v359_v53 = vmax.f32 %v357_v37, %v358_v43  ;;  %v345_v54 = vmax.f32 %v343_v15, %v344_v45  ;;  %v293_v55 = vpop.xlane.xlu0 %292 }
 0x202   :  { %v386_v56 = vsub.f32 %v321_v58, %v342_v47  ;;  %v371_v57 = vsel %vm328_vm3, %v326_v48, -inf  ;;  %v325_v4 = vadd.f32 %v317_v28, %v301_v49  ;;  %v303_v1 = vadd.f32 %v1135_v50, %v293_v55 }
 0x203   :  { %v385_v59 = vsub.f32 %v320_v60, %v335_v51  ;;  %v355_v61 = vrot.slane %v354_v52, 1  ;;  %v360_v62 = vrot.slane %v359_v53, 2  ;;  %v346_v63 = vrot.slane %v345_v54, 2 }
 0x204   :  { %v395_v3 = vmul.f32 1.442695, %v386_v56  ;;  %v372_v2 = vrot.slane %v371_v57, 4  ;;  %v364_v5 = vsel %vm328_vm3, %v325_v4, -inf  ;;  %v327_v6 = vadd.f32 %v319_v46, %v303_v1 }
 0x205   :  { %v393_v7 = vmul.f32 1.442695, %v385_v59  ;;  %v356_v8 = vmax.f32 %v354_v52, %v355_v61  ;;  %v361_v9 = vmax.f32 %v359_v53, %v360_v62  ;;  %v347_v12 = vmax.f32 %v345_v54, %v346_v63 }
 0x206   :  { %830 = vpow2.f32 %v395_v3  ;;  %v373_v58 = vmax.f32 %v371_v57, %v372_v2  ;;  %v365_v11 = vrot.slane %v364_v5, 4  ;;  %v378_v13 = vsel %vm328_vm3, %v327_v6, -inf }
 0x207   :  { %832 = vpow2.f32 %v393_v7  ;;  %v388_v50 = vsub.f32 %v1146_v0, %v356_v8  ;;  %v362_v60 = vrot.slane %v361_v9, 1  ;;  %v348_v14 = vrot.slane %v347_v12, 1 }
 0x208   :  { %v374_v17 = vrot.slane %v373_v58, 2  ;;  %v366_v18 = vmax.f32 %v364_v5, %v365_v11  ;;  %v379_v19 = vrot.slane %v378_v13, 4 }
 0x209   :  { %v399_v20 = vmul.f32 1.442695, %v388_v50  ;;  %v363_v21 = vmax.f32 %v361_v9, %v362_v60  ;;  %v349_v22 = vmax.f32 %v347_v12, %v348_v14 }
 0x20a   :  { %v375_v16 = vmax.f32 %v373_v58, %v374_v17  ;;  %v367_v23 = vrot.slane %v366_v18, 2  ;;  %v380_v24 = vmax.f32 %v378_v13, %v379_v19 }
 0x20b   :  { %834 = vpow2.f32 %v399_v20  ;;  %v389_v28 = vsub.f32 %v1154_v26, %v363_v21  ;;  %v387_v29 = vsub.f32 %v1156_v10, %v349_v22 }
 0x20c   :  { %v376_v31 = vrot.slane %v375_v16, 1  ;;  %v368_v32 = vmax.f32 %v366_v18, %v367_v23  ;;  %v381_v33 = vrot.slane %v380_v24, 2 }
 0x20d   :  { %v401_v0 = vmul.f32 1.442695, %v389_v28  ;;  %v397_v34 = vmul.f32 1.442695, %v387_v29 }
 0x20e   :  { %v377_v37 = vmax.f32 %v375_v16, %v376_v31  ;;  %v369_v15 = vrot.slane %v368_v32, 1  ;;  %v382_v38 = vmax.f32 %v380_v24, %v381_v33 }
 0x20f   :  { %836 = vpow2.f32 %v401_v0 }
 0x210   :  { %v1171_v39 = vpop.eup %830  ;;  %838 = vpow2.f32 %v397_v34  ;;  %v391_v42 = vsub.f32 %v326_v48, %v377_v37  ;;  %v370_v43 = vmax.f32 %v368_v32, %v369_v15  ;;  %v383_v45 = vrot.slane %v382_v38, 1 }
 0x211   :  { %v1173_v46 = vpop.eup %832  ;;  %v416_v26 = vsel %vm328_vm3, %v1171_v39, 0.0 }
 0x212   :  { %v417_v10 = vrot.slane %v416_v26, 4  ;;  %v409_v47 = vsel %vm328_vm3, %v1173_v46, 0.0  ;;  %v405_v49 = vmul.f32 1.442695, %v391_v42  ;;  %v390_v51 = vsub.f32 %v325_v4, %v370_v43 }
 0x213   :  { %v410_v52 = vrot.slane %v409_v47, 4  ;;  %v384_v53 = vmax.f32 %v382_v38, %v383_v45 }
 0x214   :  { %v418_v54 = vadd.f32 %v417_v10, %v416_v26  ;;  %840 = vpow2.f32 %v405_v49  ;;  %v403_v55 = vmul.f32 1.442695, %v390_v51 }
 0x215   :  { %v1179_v56 = vpop.eup %834  ;;  %v411_v48 = vadd.f32 %v410_v52, %v409_v47  ;;  %v392_v57 = vsub.f32 %v327_v6, %v384_v53 }
 0x216   :  { %v430_v1 = vsel %vm328_vm3, %v1179_v56, 0.0  ;;  %842 = vpow2.f32 %v403_v55  ;;  %v419_v59 = vrot.slane %v418_v54, 2 }
 0x217   :  { %v431_v61 = vrot.slane %v430_v1, 4  ;;  %v407_v62 = vmul.f32 1.442695, %v392_v57  ;;  %v412_v63 = vrot.slane %v411_v48, 2 }
 0x218   :  { %v420_v3 = vadd.f32 %v419_v59, %v418_v54 }
 0x219   :  { %v1183_v2 = vpop.eup %836  ;;  %v432_v4 = vadd.f32 %v431_v61, %v430_v1  ;;  %844 = vpow2.f32 %v407_v62  ;;  %v413_v5 = vadd.f32 %v412_v63, %v411_v48 }
 0x21a   :  { %v1185_v7 = vpop.eup %838  ;;  %v437_v8 = vsel %vm328_vm3, %v1183_v2, 0.0  ;;  %v421_v6 = vrot.slane %v420_v3, 1 }
 0x21b   :  { %v438_v9 = vrot.slane %v437_v8, 4  ;;  %v423_v12 = vsel %vm328_vm3, %v1185_v7, 0.0  ;;  %v414_v58 = vrot.slane %v413_v5, 1  ;;  %v433_v11 = vrot.slane %v432_v4, 2 }
 0x21c   :  { %v424_v13 = vrot.slane %v423_v12, 4  ;;  %v422_v50 = vadd.f32 %v421_v6, %v420_v3 }
 0x21d   :  { %v439_v60 = vadd.f32 %v438_v9, %v437_v8  ;;  %v415_v14 = vadd.f32 %v414_v58, %v413_v5  ;;  %v434_v17 = vadd.f32 %v433_v11, %v432_v4 }
 0x21e   :  { %v841_v18 = vpop.eup %840  ;;  %v425_v19 = vadd.f32 %v424_v13, %v423_v12  ;;  %846 = vrcp.f32 %v422_v50 }
 0x21f   :  { %v451_v20 = vsel %vm328_vm3, %v841_v18, 0.0  ;;  %848 = vrcp.f32 %v415_v14  ;;  %v435_v21 = vrot.slane %v434_v17, 1  ;;  %v440_v22 = vrot.slane %v439_v60, 2 }
 0x220   :  { %v843_v16 = vpop.eup %842  ;;  %v452_v23 = vrot.slane %v451_v20, 4  ;;  %v426_v24 = vrot.slane %v425_v19, 2 }
 0x221   :  { %v444_v28 = vsel %vm328_vm3, %v843_v16, 0.0  ;;  %v436_v29 = vadd.f32 %v435_v21, %v434_v17  ;;  %v441_v31 = vadd.f32 %v440_v22, %v439_v60 }
 0x222   :  { %v453_v32 = vadd.f32 %v452_v23, %v451_v20  ;;  %v445_v33 = vrot.slane %v444_v28, 4  ;;  %v427_v0 = vadd.f32 %v426_v24, %v425_v19 }
 0x223   :  { %v845_v34 = vpop.eup %844  ;;  %850 = vrcp.f32 %v436_v29  ;;  %v442_v37 = vrot.slane %v441_v31, 1 }
 0x224   :  { %v446_v15 = vadd.f32 %v445_v33, %v444_v28  ;;  %v458_v38 = vsel %vm328_vm3, %v845_v34, 0.0  ;;  %v428_v42 = vrot.slane %v427_v0, 1  ;;  %v454_v43 = vrot.slane %v453_v32, 2 }
 0x225   :  { %v459_v45 = vrot.slane %v458_v38, 4  ;;  %v443_v26 = vadd.f32 %v442_v37, %v441_v31 }
 0x226   :  { %v429_v10 = vadd.f32 %v428_v42, %v427_v0  ;;  %v455_v47 = vadd.f32 %v454_v43, %v453_v32  ;;  %v447_v49 = vrot.slane %v446_v15, 2 }
 0x227   :  { %v460_v51 = vadd.f32 %v459_v45, %v458_v38  ;;  %852 = vrcp.f32 %v443_v26 }
 0x228   :  { %v847_v52 = vpop.eup %846  ;;  %854 = vrcp.f32 %v429_v10  ;;  %v456_v53 = vrot.slane %v455_v47, 1  ;;  %v448_v54 = vadd.f32 %v447_v49, %v446_v15 }
 0x229   :  { %v849_v55 = vpop.eup %848  ;;  %v468_v48 = vmul.f32 %v847_v52, %v1171_v39  ;;  %v461_v57 = vrot.slane %v460_v51, 2 }
 0x22a   :  { %v466_v1 = vmul.f32 %v849_v55, %v1173_v46  ;;  %v457_v59 = vadd.f32 %v456_v53, %v455_v47  ;;  %v449_v61 = vrot.slane %v448_v54, 1 }
 0x22b   :  { %488 = vperm.xlu0 %828, %v468_v48   ;;  %v462_v62 = vadd.f32 %v461_v57, %v460_v51 }
 0x22c   :  { %483 = vperm.xlu1 %829, %v466_v1   ;;  %856 = vrcp.f32 %v457_v59  ;;  %v450_v63 = vadd.f32 %v449_v61, %v448_v54 }
 0x22d   :  { %v851_v3 = vpop.eup %850  ;;  %v463_v4 = vrot.slane %v462_v62, 1 }
 0x22e   :  { %v472_v5 = vmul.f32 %v851_v3, %v1179_v56  ;;  %858 = vrcp.f32 %v450_v63 }
 0x22f   :  { %v464_v8 = vadd.f32 %v463_v4, %v462_v62 }
 0x230   :  { %498 = vperm.xlu1 %829, %v472_v5  }
 0x231   :  { %v853_v6 = vpop.eup %852  ;;  %860 = vrcp.f32 %v464_v8 }
 0x232   :  { %v855_v39 = vpop.eup %854  ;;  %v474_v9 = vmul.f32 %v853_v6, %v1183_v2 }
 0x233   :  { %v470_v46 = vmul.f32 %v855_v39, %v1185_v7 }
 0x234   :  { %503 = vperm.xlu0 %828, %v474_v9  }
 0x235   :  { %493 = vperm.xlu1 %829, %v470_v46  }
 0x236   :  { %v857_v12 = vpop.eup %856 }
 0x237   :  { %v478_v58 = vmul.f32 %v857_v12, %v841_v18 }
 0x238   :  { %v859_v11 = vpop.eup %858 }
 0x239   :  { %513 = vperm.xlu0 %828, %v478_v58   ;;  %v476_v13 = vmul.f32 %v859_v11, %v843_v16 }
 0x23b   :  { %v861_v50 = vpop.eup %860  ;;  %508 = vperm.xlu1 %829, %v476_v13  }
 0x23c   :  { %v480_v56 = vmul.f32 %v861_v50, %v845_v34 }
 0x23e   :  { %v693_v60 = vpop.f32.mrb[0].mxu1 }
 0x23f   :  { %518 = vperm.xlu1 %829, %v480_v56   ;;  %v798_v14 = vpop.f32.mrb[1].mxu1 }
 0x2aa   :  { %v489_v17 = vpop.permute.xlu0 %488 }
 0x2ab   :  { %v522_v19 = vmul.f32 %v489_v17, %v1059_v30  ;;  %v484_v2 = vpop.permute.xlu1 %483 }
 0x2ac   :  { %v521_v7 = vmul.f32 %v484_v2, %v1050_v25 }
 0x2ad   :  { %v537_v20 = vsel %vm529_vm4, %v522_v19, 0.0 }
 0x2ae   :  { %v538_v21 = vrot.slane %v537_v20, 4  ;;  %v530_v18 = vsel %vm529_vm4, %v521_v7, 0.0 }
 0x2af   :  { %v531_v22 = vrot.slane %v530_v18, 4  ;;  %v499_v16 = vpop.permute.xlu1 %498 }
 0x2b0   :  { %v539_v23 = vadd.f32 %v538_v21, %v537_v20  ;;  %v524_v24 = vmul.f32 %v499_v16, %v1071_v35 }
 0x2b1   :  { %v532_v28 = vadd.f32 %v531_v22, %v530_v18 }
 0x2b2   :  { %v540_v29 = vrot.slane %v539_v23, 2  ;;  %v551_v31 = vsel %vm529_vm4, %v524_v24, 0.0 }
 0x2b3   :  { %v533_v32 = vrot.slane %v532_v28, 2  ;;  %v552_v33 = vrot.slane %v551_v31, 4  ;;  %v504_v30 = vpop.permute.xlu0 %503 }
 0x2b4   :  { %v525_v0 = vmul.f32 %v504_v30, %v1073_v36  ;;  %v494_v25 = vpop.permute.xlu1 %493  ;;  %v541_v15 = vadd.f32 %v540_v29, %v539_v23 }
 0x2b5   :  { %v553_v34 = vadd.f32 %v552_v33, %v551_v31  ;;  %v523_v37 = vmul.f32 %v494_v25, %v1057_v27  ;;  %v534_v42 = vadd.f32 %v533_v32, %v532_v28  ;;  %v737_v27 = vld [vmem:[%s1253_s8] ss:$0 sm:$0xff]  ;;  %s715_s8 = sshll.u32 %s914_s7, 4  ;;  %s716_s8 = int_to_ptr.vmem [resolvable:$true] %s715_s8 }
 0x2b6   :  { %v558_v38 = vsel %vm529_vm4, %v525_v0, 0.0  ;;  %v542_v51 = vrot.slane %v541_v15, 1  ;;  %v694_v62 = vadd.f32 %v737_v27, %v693_v60  ;;  %s862_s30 = scalar_lea.vmem %s716_s8, 32  ;;  %p867_p1 = scmp.lt.s32.totalorder %s716_s8, %s716_s8 }
 0x2b7   :  { %v554_v43 = vrot.slane %v553_v34, 2  ;;  %v559_v45 = vrot.slane %v558_v38, 4  ;;  %v544_v35 = vsel %vm529_vm4, %v523_v37, 0.0  ;;  %v535_v53 = vrot.slane %v534_v42, 1  ;;  %p863_p0 = scmp.ne.s32.totalorder %s716_s8, %s862_s30  ;;  %p868_p2 = scmp.lt.s32.totalorder %s862_s30, %s862_s30 }
 0x2b8   :  { %v545_v26 = vrot.slane %v544_v35, 4  ;;  %v514_v10 = vpop.permute.xlu0 %513  ;;  %v543_v63 = vadd.f32 %v542_v51, %v541_v15  ;;  %698 = vst.msk [vmem:[#allocation5] sm:$0x3] %vm697_vm8, %v694_v62 }
 0x2b9   :  { %v560_v47 = vadd.f32 %v559_v45, %v558_v38  ;;  %v527_v49 = vmul.f32 %v514_v10, %v1087_v41  ;;  %v555_v54 = vadd.f32 %v554_v43, %v553_v34  ;;  %v536_v8 = vadd.f32 %v535_v53, %v534_v42  ;;  %p869_p3 = por %p868_p2, %p867_p1 }
 0x2ba   :  { %v546_v52 = vadd.f32 %v545_v26, %v544_v35  ;;  %v509_v36 = vpop.permute.xlu1 %508 }
 0x2bb   :  { %v561_v55 = vrot.slane %v560_v47, 2  ;;  %v572_v48 = vsel %vm529_vm4, %v527_v49, 0.0  ;;  %v526_v59 = vmul.f32 %v509_v36, %v1085_v40  ;;  %v556_v6 = vrot.slane %v555_v54, 1  ;;  %p870_p4 = pnand %p869_p3, %p863_p0 }
 0x2bc   :  { %v547_v57 = vrot.slane %v546_v52, 2  ;;  %v573_v1 = vrot.slane %v572_v48, 4  ;;  %v595_v60 = vsel %vm594_vm5, %v543_v63, %v536_v8 }
 0x2bd   :  { %v562_v61 = vadd.f32 %v561_v55, %v560_v47  ;;  %v565_v4 = vsel %vm529_vm4, %v526_v59, 0.0  ;;  %v557_v14 = vadd.f32 %v556_v6, %v555_v54 }
 0x2be   :  { %v548_v41 = vadd.f32 %v547_v57, %v546_v52  ;;  %v574_v3 = vadd.f32 %v573_v1, %v572_v48  ;;  %v519_v5 = vpop.permute.xlu1 %518  ;;  %v566_v39 = vrot.slane %v565_v4, 4 }
 0x2bf   :  { %v528_v9 = vmul.f32 %v519_v5, %v1096_v44  ;;  %v563_v58 = vrot.slane %v562_v61, 1 }
 0x2c0   :  { %v549_v46 = vrot.slane %v548_v41, 1  ;;  %v575_v12 = vrot.slane %v574_v3, 2  ;;  %v567_v11 = vadd.f32 %v566_v39, %v565_v4 }
 0x2c1   :  { %v579_v40 = vsel %vm529_vm4, %v528_v9, 0.0 }
 0x2c2   :  { %v550_v13 = vadd.f32 %v549_v46, %v548_v41  ;;  %v576_v50 = vadd.f32 %v575_v12, %v574_v3  ;;  %v580_v56 = vrot.slane %v579_v40, 4  ;;  %v568_v17 = vrot.slane %v567_v11, 2 }
 0x2c4   :  { %v597_v44 = vsel %vm596_vm6, %v550_v13, %v595_v60  ;;  %v581_v19 = vadd.f32 %v580_v56, %v579_v40 }
 0x2c5   :  { %873 = shalt.err (!%p870_p4)
}
 0x2c6   :  { %s874_s13 = scalar_lea.hbm %s1255_s10, 32 }
 0x2c7   :  { %p875_p5 = scmp.ne.s32.totalorder %s1255_s10, %s874_s13  ;;  %p878_p6 = scmp.lt.u32.totalorder %s874_s13, %s1255_s10 }
 0x2c9   :  { %p880_p7 = pnand %p878_p6, %p875_p5 }
 0x2cb   :  { %883 = shalt.err (!%p880_p7)
}
 0x2cc   :  { %718 = dma.vmem_to_hbm [thread:$0]  %s716_s8, 32, %s1255_s10, [#allocation6]   ;;  %v577_v2 = vrot.slane %v576_v50, 1  ;;  %v569_v7 = vadd.f32 %v568_v17, %v567_v11  ;;  %v599_v20 = vsel %vm598_vm7, %v557_v14, %v597_v44  ;;  %vm600_vm9 = vcmask 1044484  }
 0x2cd   :  { %v564_v21 = vadd.f32 %v563_v58, %v562_v61  ;;  %v582_v18 = vrot.slane %v581_v19, 2  ;;  %vm602_vm10 = vcmask 1045509   ;;  %vm604_vm11 = vcmask 1046534   ;;  %s915_s10 = smov 96   ;;  %s916_s20 = smov [#allocation3]  }
 0x2ce   :  { %v570_v22 = vrot.slane %v569_v7, 1  ;;  %v578_v24 = vadd.f32 %v577_v2, %v576_v50  ;;  %vm606_vm12 = vcmask 1047559   ;;  %s705_s0 = sshll.u32 %s916_s20, 4  ;;  %s706_s0 = int_to_ptr.vmem [resolvable:$true] %s705_s0 }
 0x2cf   :  { %v583_v16 = vadd.f32 %v582_v18, %v581_v19  ;;  %v601_v23 = vsel %vm600_vm9, %v564_v21, %v599_v20  ;;  %s884_s21 = scalar_lea.vmem %s706_s0, 128  ;;  %p889_p9 = scmp.lt.s32.totalorder %s706_s0, %s706_s0 }
 0x2d0   :  { %v571_v28 = vadd.f32 %v570_v22, %v569_v7  ;;  %p885_p8 = scmp.ne.s32.totalorder %s706_s0, %s884_s21  ;;  %p890_p10 = scmp.lt.s32.totalorder %s884_s21, %s884_s21 }
 0x2d1   :  { %v584_v29 = vrot.slane %v583_v16, 1 }
 0x2d2   :  { %v603_v31 = vsel %vm602_vm10, %v571_v28, %v601_v23  ;;  %p891_p11 = por %p890_p10, %p889_p9 }
 0x2d3   :  { %v585_v32 = vadd.f32 %v584_v29, %v583_v16  ;;  %v605_v33 = vsel %vm604_vm11, %v578_v24, %v603_v31 }
 0x2d4   :  { %p892_p12 = pnand %p891_p11, %p885_p8 }
 0x2d5   :  { %v607_v30 = vsel %vm606_vm12, %v585_v32, %v605_v33 }
 0x2d6   :  { %608 = vrot.lane.b32.xlu0 %v607_v30, %s915_s10 }
 0x348   :  { %v609_v0 = vpop.permute.xlu0 %608 }
 0x349   :  { %611 = vst.msk [vmem:[#allocation3] sm:$0xff] %vm269_vm1, %v609_v0 }
 0x34a   :  { %895 = shalt.err (!%p892_p12)
}
 0x34b   :  { %s896_s22 = scalar_lea.hbm %s1254_s9, 128 }
 0x34c   :  { %p897_p13 = scmp.ne.s32.totalorder %s1254_s9, %s896_s22  ;;  %p900_p0 = scmp.lt.u32.totalorder %s896_s22, %s1254_s9 }
 0x34e   :  { %p902_p1 = pnand %p900_p0, %p897_p13 }
 0x350   :  { %905 = shalt.err (!%p902_p1)
}
 0x351   :  { %708 = dma.vmem_to_hbm [thread:$0]  %s706_s0, 128, %s1254_s9, [#allocation4]  }
 0x352   :  { %906 = dma.done.wait [#allocation4], 128  }
 0x353   :  { %907 = vsyncadd [#allocation4], 4294967168 }
 0x354   :  { %908 = dma.done.wait [#allocation6], 32  }
 0x355   :  { %909 = vsyncadd [#allocation6], 4294967264 }
 0x356   :  { %725 = vsyncpa [#allocation4], 1 }
 0x357   :  { %726 = vsyncpa [#allocation6], 1 }

</bundles_post_ra>
